<compile_context>
chip_gen: v7x
topology: tpu7x:2x2x1
jax: 0.10.0
libtpu: 0.0.40
codegen_flags: <defaults>
</compile_context>

<pallas_src>
import math
import functools

import jax
import jax.numpy as jnp
from jax.experimental import pallas as pl
from jax.experimental.pallas import tpu as pltpu


def _round_up(a, b):
    return ((a + b - 1) // b) * b


@functools.lru_cache(maxsize=1)
def _vmem_limit_bytes():
    """Generation-aware VMEM budget: ~3/4 of physical, capped at 96 MiB.

    v5e/v6e (128 MiB physical) -> 96 MiB; v7x (64 MiB per TC) -> 48 MiB;
    unknown -> conservative 48 MiB.
    """
    try:
        phys = pltpu.get_tpu_info().vmem_capacity_bytes
    except Exception:
        phys = 64 * 1024 * 1024
    return int(min(96 * 1024 * 1024, (phys * 3) // 4))


# ----------------------------------------------------------------------------
# Kernels
# ----------------------------------------------------------------------------
def _mm_direct_kernel(x_ref, wt_ref, *refs, has_bias):
    """f32 output: accumulate straight into the resident output block.

    x_ref : (tm, tk), wt_ref : (tk, tn), [b_ref : (1, tn) f32], o_ref : (tm, tn) f32
    The output BlockSpec returns the same (i, j) block for every K step, so
    o_ref is resident across the K grid axis and doubles as the accumulator.
    """
    if has_bias:
        b_ref, o_ref = refs
    else:
        (o_ref,) = refs

    k = pl.program_id(2)
    prod = jnp.dot(x_ref[...], wt_ref[...], preferred_element_type=jnp.float32)

    @pl.when(k == 0)
    def _():
        o_ref[...] = prod          # first K step: write directly, no zero-init

    @pl.when(k > 0)
    def _():
        o_ref[...] += prod

    if has_bias:
        @pl.when(k == pl.num_programs(2) - 1)
        def _():
            o_ref[...] += b_ref[...]


def _mm_acc_kernel(x_ref, wt_ref, *refs, has_bias):
    """Non-f32 output: f32 VMEM scratch accumulator, cast in the finalize step."""
    if has_bias:
        b_ref, o_ref, acc_ref = refs
    else:
        o_ref, acc_ref = refs

    k = pl.program_id(2)
    prod = jnp.dot(x_ref[...], wt_ref[...], preferred_element_type=jnp.float32)

    @pl.when(k == 0)
    def _():
        acc_ref[...] = prod        # first K step: write directly, no zero-init

    @pl.when(k > 0)
    def _():
        acc_ref[...] += prod

    @pl.when(k == pl.num_programs(2) - 1)
    def _():
        res = acc_ref[...]
        if has_bias:
            res = res + b_ref[...]
        o_ref[...] = res.astype(o_ref.dtype)


# ----------------------------------------------------------------------------
# Wrapper
# ----------------------------------------------------------------------------
def structured_linear(x, weight=None, bias=None, *, weight_t=None,
                      tm=512, tn=512, tk=None, compute_dtype=None):
    """StructuredLinear forward: y = x @ W.T + bias (base-class dense semantics).

    x        : (..., in_features)
    weight   : (out_features, in_features)   PyTorch layout, OR
    weight_t : (in_features, out_features)   pre-transposed (K, N) layout.
               Store the parameter this way to avoid paying a K*N HBM transpose
               pass on every call.
    bias     : (out_features,) or None
    compute_dtype : e.g. jnp.bfloat16 to run the MXU in bf16 (f32 accumulation).
    """
    if weight_t is not None:
        in_features, out_features = weight_t.shape
        wt = weight_t
        w_dtype = weight_t.dtype
    else:
        out_features, in_features = weight.shape
        wt = weight.T    # TODO(synk): callers should cache this (K, N) layout at init.
        w_dtype = weight.dtype

    orig_shape = x.shape
    assert orig_shape[-1] == in_features
    out_dtype = jnp.promote_types(x.dtype, w_dtype)

    x2d = x.reshape(-1, in_features)
    m = x2d.shape[0]

    # Unify compute dtype (optionally downcast to bf16 for MXU rate / HBM BW).
    cdt = jnp.dtype(compute_dtype) if compute_dtype is not None else jnp.dtype(out_dtype)
    if x2d.dtype != cdt:
        x2d = x2d.astype(cdt)
    if wt.dtype != cdt:
        wt = wt.astype(cdt)
    itemsize = cdt.itemsize

    # MXU-friendly K tile (bigger for narrower dtypes).
    if tk is None:
        tk = 512 if itemsize >= 4 else 1024

    # ---- tile selection -----------------------------------------------------
    sub = 8 * max(1, 4 // itemsize)          # sublane granule: 8 f32 / 16 bf16
    m_gran = _round_up(m, sub)
    n_gran = _round_up(out_features, 128)
    k_gran = _round_up(in_features, 128)

    tm_eff = min(tm, m_gran)
    tn_eff = min(tn, n_gran)
    tk_eff = min(tk, k_gran)

    m_pad = _round_up(m, tm_eff)
    n_pad = _round_up(out_features, tn_eff)

    # Guarantee >=2 tiles on a "parallel" axis so v7x's second TensorCore has work.
    if (m_pad // tm_eff) * (n_pad // tn_eff) < 2:
        if n_gran >= 256:
            tn_eff = max(128, (n_gran // 2) // 128 * 128)
            n_pad = _round_up(out_features, tn_eff)
        elif m_gran >= 2 * sub:
            tm_eff = max(sub, (m_gran // 2) // sub * sub)
            m_pad = _round_up(m, tm_eff)

    need_acc = jnp.dtype(out_dtype) != jnp.dtype(jnp.float32)
    has_bias = bias is not None
    vmem_limit = _vmem_limit_bytes()
    out_itemsize = jnp.dtype(out_dtype).itemsize

    # Keep the double-buffered working set within ~2/3 of the VMEM budget
    # (matters on v7x's 64 MiB VMEM if the caller requests huge tiles).
    def _working_set(tk_):
        ws = 2 * (tm_eff * tk_ + tk_ * tn_eff) * itemsize      # 2x-buffered inputs
        ws += tm_eff * tn_eff * out_itemsize                    # resident output
        if need_acc:
            ws += tm_eff * tn_eff * 4                           # f32 accumulator
        if has_bias:
            ws += 2 * tn_eff * 4                                # bias row
        return ws

    while _working_set(tk_eff) > (vmem_limit * 2) // 3 and tk_eff > 128:
        tk_eff = max(128, (tk_eff // 2) // 128 * 128)

    k_pad = _round_up(in_features, tk_eff)

    # ---- padding (no-ops when shapes are already tile-aligned) --------------
    if (m_pad, k_pad) != (m, in_features):
        x2d = jnp.pad(x2d, ((0, m_pad - m), (0, k_pad - in_features)))
    if (k_pad, n_pad) != (in_features, out_features):
        wt = jnp.pad(wt, ((0, k_pad - in_features), (0, n_pad - out_features)))

    grid = (m_pad // tm_eff, n_pad // tn_eff, k_pad // tk_eff)

    x_spec = pl.BlockSpec((tm_eff, tk_eff), lambda i, j, k: (i, k))
    w_spec = pl.BlockSpec((tk_eff, tn_eff), lambda i, j, k: (k, j))
    o_spec = pl.BlockSpec((tm_eff, tn_eff), lambda i, j, k: (i, j))

    # Cost estimate that counts re-streaming of x / W across the grid.
    flops = 2 * m_pad * n_pad * k_pad
    bytes_accessed = (m_pad * k_pad * itemsize * (n_pad // tn_eff)       # x re-read per N tile
                      + k_pad * n_pad * itemsize * (m_pad // tm_eff)     # W re-read per M tile
                      + m_pad * n_pad * out_itemsize)                    # output

    in_specs = [x_spec, w_spec]
    operands = [x2d, wt]
    if has_bias:
        bias_row = bias.reshape(1, out_features).astype(jnp.float32)
        if n_pad != out_features:
            bias_row = jnp.pad(bias_row, ((0, 0), (0, n_pad - out_features)))
        in_specs.append(pl.BlockSpec((1, tn_eff), lambda i, j, k: (0, j)))
        operands.append(bias_row)
        bytes_accessed += n_pad * 4 * (m_pad // tm_eff)

    if need_acc:
        kernel = functools.partial(_mm_acc_kernel, has_bias=has_bias)
        scratch = [pltpu.VMEM((tm_eff, tn_eff), jnp.float32)]
    else:
        kernel = functools.partial(_mm_direct_kernel, has_bias=has_bias)
        scratch = []

    out2d = pl.pallas_call(
        kernel,
        out_shape=jax.ShapeDtypeStruct((m_pad, n_pad), out_dtype),
        grid_spec=pltpu.PrefetchScalarGridSpec(
            num_scalar_prefetch=0,
            grid=grid,
            in_specs=in_specs,
            out_specs=o_spec,
            scratch_shapes=scratch,
        ),
        compiler_params=pltpu.CompilerParams(
            dimension_semantics=("parallel", "parallel", "arbitrary"),
            vmem_limit_bytes=vmem_limit,
        ),
        cost_estimate=pl.CostEstimate(
            flops=flops, transcendentals=0, bytes_accessed=bytes_accessed),
    )(*operands)

    out2d = out2d[:m, :out_features]
    return out2d.reshape(*orig_shape[:-1], out_features)


def init_structured_linear_params(key, in_features, out_features, dtype=jnp.float32):
    """Deterministic init matching the PyTorch module's conventions.

    Weight: kaiming_uniform_(a=sqrt(5)) => U(-1/sqrt(fan_in), 1/sqrt(fan_in)),
            fan_in = in_features.
    Bias:   U(-bound, bound), bound = 1/sqrt(out_features)
            (as written in reset_parameters_bias of the base class).
    """
    kw, kb = jax.random.split(key)
    w_bound = 1.0 / math.sqrt(in_features)
    weight = jax.random.uniform(
        kw, (out_features, in_features), dtype=dtype, minval=-w_bound, maxval=w_bound
    )
    b_bound = 1.0 / math.sqrt(out_features)
    bias = jax.random.uniform(
        kb, (out_features,), dtype=dtype, minval=-b_bound, maxval=b_bound
    )
    return weight, bias


if __name__ == "__main__":
    key = jax.random.PRNGKey(0)
    k_x, k_p, k_x2, k_p2, k_x3, k_p3 = jax.random.split(key, 6)

    # --- small demo shapes (tiny problem; exercises the >=2-parallel-tile path)
    batch, seq, in_features, out_features = 2, 8, 32, 64
    x = jax.random.normal(k_x, (batch, seq, in_features), dtype=jnp.float32)
    weight, bias = init_structured_linear_params(k_p, in_features, out_features)

    y = structured_linear(x, weight, bias)
    y = jax.block_until_ready(y)
    y_ref = x @ weight.T + bias
    assert y.shape == (batch, seq, out_features)
    assert jnp.allclose(y, y_ref, atol=1e-5, rtol=1e-5)

    # --- larger shape: multi-tile N, forced multi-step K (direct f32 accumulation),
    #     padding, pre-transposed weight path, and no-bias path ----------------
    b2, s2, in2, out2 = 4, 96, 384, 320
    x2 = jax.random.normal(k_x2, (b2, s2, in2), dtype=jnp.float32)
    w2, b2_bias = init_structured_linear_params(k_p2, in2, out2)

    y2 = structured_linear(x2, w2, b2_bias, tk=128)   # 3 K steps: exercises k>0 accumulate
    y2 = jax.block_until_ready(y2)
    y2_ref = x2 @ w2.T + b2_bias
    assert y2.shape == (b2, s2, out2)
    assert jnp.allclose(y2, y2_ref, atol=1e-4, rtol=1e-4)

    w2_t = w2.T                                       # hoisted (K, N) layout
    y3 = structured_linear(x2, bias=None, weight_t=w2_t)   # bias-free, pre-transposed
    y3 = jax.block_until_ready(y3)
    assert jnp.allclose(y3, x2 @ w2.T, atol=1e-4, rtol=1e-4)

    # --- bf16 inputs: exercises the scratch-accumulator (non-f32 output) kernel
    b3, s3, in3, out3 = 2, 64, 256, 512
    x3 = jax.random.normal(k_x3, (b3, s3, in3), dtype=jnp.float32).astype(jnp.bfloat16)
    w3, b3_bias = init_structured_linear_params(k_p3, in3, out3, dtype=jnp.bfloat16)

    y4 = structured_linear(x3, w3, b3_bias)
    y4 = jax.block_until_ready(y4)
    y4_ref = (x3.astype(jnp.float32) @ w3.astype(jnp.float32).T
              + b3_bias.astype(jnp.float32))
    assert y4.dtype == jnp.bfloat16
    assert jnp.allclose(y4.astype(jnp.float32), y4_ref, atol=5e-2, rtol=5e-2)

    print("KERNEL_OK")
</pallas_src>

<mosaic_0001>
module attributes {stable_mosaic.version = 11 : i64} {
  func.func @_mm_direct_kernel(%arg0: i32, %arg1: i32, %arg2: i32, %arg3: memref<8x128xf32, #tpu.memory_space<vmem>>, %arg4: memref<128x128xf32, #tpu.memory_space<vmem>>, %arg5: memref<1x128xf32, #tpu.memory_space<vmem>>, %arg6: memref<8x128xf32, #tpu.memory_space<vmem>>) attributes {dimension_semantics = [#tpu.dimension_semantics<parallel>, #tpu.dimension_semantics<parallel>, #tpu.dimension_semantics<arbitrary>], iteration_bounds = array<i64: 2, 1, 1>, scalar_prefetch = 0 : i64, scratch_operands = 0 : i64, tpu.core_type = #tpu.core_type<tc>, window_params = [{transform_indices = @transform_0, window_bounds = array<i64: 8, 128>}, {transform_indices = @transform_1, window_bounds = array<i64: 128, 128>}, {transform_indices = @transform_2, window_bounds = array<i64: 1, 128>}, {transform_indices = @transform_3, window_bounds = array<i64: 8, 128>}]} {
    %c0 = arith.constant 0 : index
    %c0_0 = arith.constant 0 : index
    %0 = vector.load %arg3[%c0, %c0_0] : memref<8x128xf32, #tpu.memory_space<vmem>>, vector<8x128xf32>
    %c0_1 = arith.constant 0 : index
    %c0_2 = arith.constant 0 : index
    %1 = vector.load %arg4[%c0_1, %c0_2] : memref<128x128xf32, #tpu.memory_space<vmem>>, vector<128x128xf32>
    %cst = arith.constant dense<0.000000e+00> : vector<8x128xf32>
    %2 = tpu.matmul %0, %1, %cst {dimension_numbers = #tpu.dot_dimension_numbers<[1], [0], [0], [1], [0, 0, 1, 1], [], []>} : vector<8x128xf32>, vector<128x128xf32>, vector<8x128xf32> -> vector<8x128xf32>
    %c0_i32 = arith.constant 0 : i32
    %3 = arith.cmpi eq, %arg2, %c0_i32 : i32
    %4 = arith.extui %3 : i1 to i32
    %c0_i32_3 = arith.constant 0 : i32
    %5 = arith.cmpi ne, %4, %c0_i32_3 : i32
    scf.if %5 {
      %c0_8 = arith.constant 0 : index
      %c0_9 = arith.constant 0 : index
      %12 = vector.load %arg6[%c0_8, %c0_9] : memref<8x128xf32, #tpu.memory_space<vmem>>, vector<8x128xf32>
      tpu.vector_store %arg6[%c0_8, %c0_9], %2 {strides = array<i32>} : memref<8x128xf32, #tpu.memory_space<vmem>>, vector<8x128xf32>,
    } else {
    }
    %c0_i32_4 = arith.constant 0 : i32
    %6 = arith.cmpi sgt, %arg2, %c0_i32_4 : i32
    %7 = arith.extui %6 : i1 to i32
    %c0_i32_5 = arith.constant 0 : i32
    %8 = arith.cmpi ne, %7, %c0_i32_5 : i32
    scf.if %8 {
      %c0_8 = arith.constant 0 : index
      %c0_9 = arith.constant 0 : index
      %12 = vector.load %arg6[%c0_8, %c0_9] : memref<8x128xf32, #tpu.memory_space<vmem>>, vector<8x128xf32>
      %13 = arith.addf %12, %2 : vector<8x128xf32>
      %c0_10 = arith.constant 0 : index
      %c0_11 = arith.constant 0 : index
      %14 = vector.load %arg6[%c0_10, %c0_11] : memref<8x128xf32, #tpu.memory_space<vmem>>, vector<8x128xf32>
      tpu.vector_store %arg6[%c0_10, %c0_11], %13 {strides = array<i32>} : memref<8x128xf32, #tpu.memory_space<vmem>>, vector<8x128xf32>,
    } else {
    }
    %c0_i32_6 = arith.constant 0 : i32
    %9 = arith.cmpi eq, %arg2, %c0_i32_6 : i32
    %10 = arith.extui %9 : i1 to i32
    %c0_i32_7 = arith.constant 0 : i32
    %11 = arith.cmpi ne, %10, %c0_i32_7 : i32
    scf.if %11 {
      %c0_8 = arith.constant 0 : index
      %c0_9 = arith.constant 0 : index
      %12 = vector.load %arg6[%c0_8, %c0_9] : memref<8x128xf32, #tpu.memory_space<vmem>>, vector<8x128xf32>
      %c0_10 = arith.constant 0 : index
      %c0_11 = arith.constant 0 : index
      %13 = vector.load %arg5[%c0_10, %c0_11] : memref<1x128xf32, #tpu.memory_space<vmem>>, vector<1x128xf32>
      %14 = vector.broadcast %13 : vector<1x128xf32> to vector<8x128xf32>
      %15 = arith.addf %12, %14 : vector<8x128xf32>
      %c0_12 = arith.constant 0 : index
      %c0_13 = arith.constant 0 : index
      %16 = vector.load %arg6[%c0_12, %c0_13] : memref<8x128xf32, #tpu.memory_space<vmem>>, vector<8x128xf32>
      tpu.vector_store %arg6[%c0_12, %c0_13], %15 {strides = array<i32>} : memref<8x128xf32, #tpu.memory_space<vmem>>, vector<8x128xf32>,
    } else {
    }
    return
  }
  func.func @transform_0(%arg0: i32, %arg1: i32, %arg2: i32) -> (i32, i32) {
    %c0_i32 = arith.constant 0 : i32
    return %arg0, %arg2 : i32, i32
  }
  func.func @transform_1(%arg0: i32, %arg1: i32, %arg2: i32) -> (i32, i32) {
    %c0_i32 = arith.constant 0 : i32
    return %arg2, %arg1 : i32, i32
  }
  func.func @transform_2(%arg0: i32, %arg1: i32, %arg2: i32) -> (i32, i32) {
    %c0_i32 = arith.constant 0 : i32
    %c0_i32_0 = arith.constant 0 : i32
    return %c0_i32, %arg1 : i32, i32
  }
  func.func @transform_3(%arg0: i32, %arg1: i32, %arg2: i32) -> (i32, i32) {
    %c0_i32 = arith.constant 0 : i32
    return %arg0, %arg1 : i32, i32
  }
}

</mosaic_0001>

<bundles_post_ra>
// kernel: tpu_custom_call.1
= control target key start
LH: loop header
LB: loop body
LE: loop exit
PB: predicated region body
PF: predicated region fallthrough
CT: control target
= control target key end

     0   :  { %8 = vsyncpa [#allocation3], 0  ;;  %s1056_s0 = inlined_call_operand.hbm [shape: f32[16,128], index: 0, kind: input, shape index: {}]   ;;  %s1057_s1 = inlined_call_operand.hbm [shape: f32[128,128], index: 1, kind: input, shape index: {}]   ;;  %s1058_s2 = inlined_call_operand.vmem [shape: f32[1,128], index: 2, kind: input, shape index: {}]   ;;  %s1059_s3 = inlined_call_operand.hbm [shape: f32[16,128], index: 3, kind: output, shape index: {}]  }
   0x1   :  { %10 = vsyncpa [#allocation3 + $0x1], 0 }
   0x2   :  { %11 = vsyncpa [#allocation6], 0 }
   0x3   :  { %12 = vsyncpa [#allocation4], 0 }
   0x4   :  { %14 = vsyncpa [#allocation4 + $0x1], 0  ;;  %s832_s12 = smov 0   ;;  %s834_s13 = smov 0  }
   0x5   :  { %s836_s14 = smov 0   ;;  %s838_s15 = smov 0  }
   0x6   :  { %s840_s16 = smov 0   ;;  %s842_s17 = smov 0  }
   0x7 LB: > { %s487_s18 = sadd.s32 4294967295, %s802_s17   ;;  %s488_s19 = sadd.s32 4294967294, %s802_s17   ;;  %s802_s17 = sphi %s842_s17, %s20_s17   ;;  %s798_s16 = sphi %s840_s16, %s1083_s16   ;;  %s794_s15 = sphi %s838_s15, %s1082_s15   ;;  %s790_s14 = sphi %s836_s14, %s1081_s14   ;;  %s786_s13 = sphi %s834_s13, %s1080_s13   ;;  %s782_s12 = sphi %s832_s12, %s1079_s12  }
   0x8   : > { %p61_p0 = scmp.ne.s32.totalorder %s786_s13, %s782_s12  ;;  %p866_p1 = scmp.eq.s32.totalorder %s487_s18, 0 }
   0x9   : > { %p870_p2 = scmp.eq.s32.totalorder %s487_s18, 1  ;;  %p147_p3 = scmp.eq.s32.totalorder %s488_s19, 1 }
   0xa   : > { %s1064_s20 = scalar_select %p866_p1, 1, 0 }
   0xb   : > { %s1065_s21 = scalar_select %p870_p2, 1, 0 }
   0xc   : > { %p876_p4 = por %p866_p1, %p61_p0  ;;  %p489_p5 = scmp.ge.s32.totalorder %s802_s17, 1 }
   0xd   : > { %p881_p6 = por %p147_p3, %p61_p0  ;;  %p154_p7 = scmp.lt.s32.totalorder %s802_s17, 3 }
   0xe   : > { %s1066_s22 = scalar_select %p876_p4, 1, 0 }
   0xf   : > { %s1067_s23 = scalar_select %p881_p6, 1, 0 }
  0x10   : > { %p886_p8 = pnand %p489_p5, %p154_p7  ;;  %s804_s25 = smov [#allocation5]  }
  0x11   : > { %s170_s26 = sshll.u32 %s804_s25, 4  ;;  %s39_s28 = sadd.s32 1, %s798_s16  ;;  %s171_s26 = int_to_ptr.vmem [resolvable:$true] %s170_s26 }
  0x12   : > { %s1068_s24 = scalar_select %p886_p8, 1, 0 }
  0x13   : > { %p588_p9 = pneg %p886_p8  ;;  %s658_s4 = scalar_lea.hbm %s1057_s1, 2048 }
  0x14   : > { %p659_p12 = scmp.ne.s32.totalorder %s1057_s1, %s658_s4  ;;  %p665_p5 = scmp.lt.u32.totalorder %s658_s4, %s1057_s1 }
  0x15   : > { %p895_p11 = pnand %p588_p9, %p866_p1 }
  0x17   : > { %p660_p13 = pneg %p895_p11 }
  0x19   : > { %p661_p0 = pnand %p660_p13, %p659_p12 }
  0x1b   : > { %p662_p3 = pneg %p661_p0 }
  0x1d   : > { %p667_p7 = pnand %p665_p5, %p662_p3 }
  0x1f   : > { %670 = shalt.err (!%p667_p7)
}
  0x20   : > { %s671_s9 = scalar_lea.vmem %s171_s26, 2048  ;;  %p679_p1 = scmp.lt.s32.totalorder %s171_s26, %s171_s26 }
  0x21   : > { %p672_p9 = scmp.ne.s32.totalorder %s171_s26, %s671_s9  ;;  %p680_p4 = scmp.lt.s32.totalorder %s671_s9, %s671_s9 }
  0x23   : > { %p674_p10 = pnand %p672_p9, %p660_p13  ;;  %p681_p8 = por %p680_p4, %p679_p1 }
  0x25   : > { %p675_p6 = pneg %p674_p10 }
  0x27   : > { %p682_p2 = pnand %p681_p8, %p675_p6 }
  0x29   : > { %685 = shalt.err (!%p682_p2)
}
  0x2a   : > { %s805_s10 = smov 128   ;;  %s806_s11 = smov 8  }
  0x2b   : > { %591 = dma.hbm_to_vmem [thread:$0]  (!%p895_p11), %s1057_s1, 2048, %s171_s26, [#allocation6], %s805_s10, %s805_s10, %s806_s11  }
  0x2c   : > { %p41_p1 = scmp.ge.s32.totalorder %s39_s28, 2  ;;  %s48_s25 = sadd.s32 1, %s790_s14 }
  0x2d   : > { %p55_p2 = scmp.ne.s32.totalorder %s790_s14, %s786_s13  ;;  %p56_p4 = scmp.eq.s32.totalorder %s802_s17, 0 }
  0x2e   : > { %s1085_s28 = smov (%p41_p1, %s39_s28), 0  ;;  %p1071_p8 = scmp.ne.s32.totalorder %s1065_s21, 0 }
  0x2f   : > { %p922_p6 = por %p56_p4, %p55_p2  ;;  %s43_s27 = ssub.s32 %s798_s16, %s1085_s28 }
  0x30   : > { %p928_p10 = por %p1071_p8, %p55_p2  ;;  %p601_p12 = scmp.lt.s32.totalorder %s802_s17, 2 }
  0x31   : > { %p46_p11 = scmp.eq.s32.totalorder %s43_s27, 0  ;;  %s190_s26 = sand.u32 1, %s790_s14  }
  0x32   : > { %s493_s4 = sshll.u32 %s190_s26, 3  ;;  %s494_s6 = sshll.u32 %s798_s16, 7 }
  0x33   : > { %s937_s5 = scalar_select %p46_p11, %s790_s14, %s48_s25  }
  0x34   : > { %s943_s9 = scalar_lea.hbm %s1056_s0, %s494_s6  ;;  %s194_s21 = scalar_lea.vmem [#allocation2], %s493_s4 }
  0x35   : > { %s202_s10 = sshll.u32 %s194_s21, 4  ;;  %p949_p13 = pnand %p601_p12, %p922_p6  ;;  %s945_s10 = int_to_ptr.vmem [resolvable:$true] %s202_s10 }
  0x36   : > { %s191_s18 = scalar_lea.sflag [#allocation3], %s190_s26  ;;  %s686_s19 = scalar_lea.hbm %s943_s9, 128 }
  0x37   : > { %p687_p0 = scmp.ne.s32.totalorder %s943_s9, %s686_s19  ;;  %p688_p3 = pneg %p949_p13 }
  0x38   : > { %s691_s4 = scalar_lea.hbm %s1056_s0, 256  ;;  %p692_p9 = scmp.lt.u32.totalorder %s943_s9, %s1056_s0 }
  0x39   : > { %p689_p5 = pnand %p688_p3, %p687_p0  ;;  %p693_p1 = scmp.lt.u32.totalorder %s691_s4, %s686_s19 }
  0x3a   : > { %p695_p4 = scmp.lt.u32.totalorder %s686_s19, %s943_s9 }
  0x3b   : > { %p690_p7 = pneg %p689_p5  ;;  %p694_p2 = por %p693_p1, %p692_p9 }
  0x3d   : > { %p696_p6 = por %p695_p4, %p694_p2 }
  0x3f   : > { %p697_p8 = pnand %p696_p6, %p690_p7 }
  0x41   : > { %700 = shalt.err (!%p697_p8)
}
  0x42   : > { %s701_s26 = scalar_lea.vmem %s945_s10, 128  ;;  %s807_s7 = smov [#allocation2]  }
  0x43   : > { %p702_p12 = scmp.ne.s32.totalorder %s945_s10, %s701_s26  ;;  %s706_s8 = sshll.u32 %s807_s7, 4  ;;  %s707_s8 = int_to_ptr.vmem [resolvable:$false] %s706_s8 }
  0x44   : > { %s708_s21 = scalar_lea.vmem %s707_s8, 256  ;;  %p709_p5 = scmp.lt.s32.totalorder %s945_s10, %s707_s8 }
  0x45   : > { %p704_p11 = pnand %p702_p12, %p688_p3  ;;  %p710_p9 = scmp.lt.s32.totalorder %s708_s21, %s701_s26 }
  0x47   : > { %p705_p0 = pneg %p704_p11  ;;  %p711_p1 = por %p710_p9, %p709_p5 }
  0x49   : > { %p712_p2 = pnand %p711_p1, %p705_p0 }
  0x4b   : > { %715 = shalt.err (!%p712_p2)
}
  0x4c   : > { %595 = dma.hbm_to_vmem [thread:$0]  (!%p949_p13), %s943_s9, 128, %s945_s10, %s191_s18  }
  0x4d   : > { %p1074_p7 = scmp.ne.s32.totalorder %s1068_s24, 0 }
  0x4e   : > { %s981_s19 = sand.u32 (!%p1074_p7), 1, %s786_s13   ;;  %p1075_p3 = scmp.ne.s32.totalorder (!%p1074_p7), %s1066_s22, 0 }
  0x4f   : > { %211 = sbr.rel (%p1074_p7) target bundleno = 353 (0x161), region = 32  ;;  %s496_s25 = sshll.u32 (!%p1074_p7), %s981_s19, 3 }
  0x50   : > { %s214_s27 = scalar_lea.sflag (!%p1074_p7), [#allocation3], %s981_s19  ;;  %s987_s4 = scalar_lea.vmem (!%p1074_p7), [#allocation2], %s496_s25 }
  0x56   : > { %769 = dma.done.wait (%p1075_p3), %s214_s27, 128  }
  0x57   : > { %771 = vsyncadd (%p1075_p3), %s214_s27, 4294967168  ;;  %p1076_p13 = scmp.ne.s32.totalorder %s1064_s20, 0 }
  0x59   : > { %773 = dma.done.wait (%p1076_p13), [#allocation6], 2048  }
  0x5a   : > { %775 = vsyncadd (%p1076_p13), [#allocation6], 4294965248  ;;  %v808_v0 = vmov 0.0|0.0   ;;  %vm809_vm0 = vmmov 0   ;;  %v810_v1 = vmov 0.0   ;;  %v252_v2 = vld [vmem:[#allocation5] sm:$0xff] }
  0x5b   : > { %556 = vmatprep.subr.bf16.mxu0 %v808_v0  ;;  %553 = vmatprep.mubr.msk.f32.mxu0 %vm809_vm0, %v810_v1  ;;  %v253_v3 = vld [vmem:[#allocation5 + $0x8] sm:$0xff]  ;;  %v254_v4 = vld [vmem:[#allocation5 + $0x10] sm:$0xff]  ;;  %v255_v6 = vld [vmem:[#allocation5 + $0x18] sm:$0xff]  ;;  %s501_s24 = sshll.u32 %s794_s15, 7  ;;  %s246_s9 = scalar_lea.vmem [#allocation7], %s496_s25 }
  0x5c   : > { %v557_v5 = vpack.c.bf16 %v253_v3, %v252_v2  ;;  %v560_v7 = vpack.c.bf16 %v255_v6, %v254_v4  ;;  %v256_v8 = vld [vmem:[#allocation5 + $0x20] sm:$0xff]  ;;  %v257_v9 = vld [vmem:[#allocation5 + $0x28] sm:$0xff]  ;;  %v258_v11 = vld [vmem:[#allocation5 + $0x30] sm:$0xff]  ;;  %s378_s10 = sshll.u32 %s246_s9, 4  ;;  %s1007_s29 = scalar_lea.hbm %s1059_s3, %s501_s24  ;;  %s1009_s10 = int_to_ptr.vmem [resolvable:$true] %s378_s10 }
  0x5d   : > { %v563_v10 = vpack.c.bf16 %v257_v9, %v256_v8  ;;  %v259_v12 = vld [vmem:[#allocation5 + $0x38] sm:$0xff]  ;;  %v260_v14 = vld [vmem:[#allocation5 + $0x40] sm:$0xff]  ;;  %v261_v15 = vld [vmem:[#allocation5 + $0x48] sm:$0xff]  ;;  %s364_s6 = scalar_lea.sflag [#allocation4], %s981_s19  ;;  %s716_s26 = scalar_lea.vmem %s1009_s10, 128 }
  0x5e   : > { %558 = vmatpush3.bf16.msra.mxu0 %v557_v5  ;;  %v566_v13 = vpack.c.bf16 %v259_v12, %v258_v11  ;;  %v569_v16 = vpack.c.bf16 %v261_v15, %v260_v14  ;;  %v262_v17 = vld [vmem:[#allocation5 + $0x50] sm:$0xff]  ;;  %v263_v18 = vld [vmem:[#allocation5 + $0x58] sm:$0xff]  ;;  %v264_v20 = vld [vmem:[#allocation5 + $0x60] sm:$0xff]  ;;  %p717_p4 = scmp.ne.s32.totalorder %s1009_s10, %s716_s26  ;;  %s811_s15 = smov [#allocation7]  }
  0x5f   : > { %559 = vmatprep.subr.bf16.mxu0 %v808_v0  ;;  %v572_v19 = vpack.c.bf16 %v263_v18, %v262_v17  ;;  %v265_v21 = vld [vmem:[#allocation5 + $0x68] sm:$0xff]  ;;  %v266_v23 = vld [vmem:[#allocation5 + $0x70] sm:$0xff]  ;;  %v267_v24 = vld [vmem:[#allocation5 + $0x78] sm:$0xff]  ;;  %s720_s7 = sshll.u32 %s811_s15, 4  ;;  %s721_s7 = int_to_ptr.vmem [resolvable:$false] %s720_s7 }
  0x60   : > { %v575_v22 = vpack.c.bf16 %v265_v21, %v264_v20  ;;  %v578_v25 = vpack.c.bf16 %v267_v24, %v266_v23  ;;  %v251_v26 = vld [vmem:[%s987_s4] sm:$0xff]  ;;  %p718_p6 = pnand %p717_p4, %p928_p10  ;;  %s722_s8 = scalar_lea.vmem %s721_s7, 256 }
  0x61   : > { %v499_v27 = vld [vmem:[%s1058_s2] ss:$0 sm:$0xff]  ;;  %p723_p12 = scmp.lt.s32.totalorder %s1009_s10, %s721_s7  ;;  %p724_p11 = scmp.lt.s32.totalorder %s722_s8, %s716_s26 }
  0x62   : > { %561 = vmatpush3.bf16.msra.mxu0 %v560_v7  ;;  %p719_p8 = pneg %p718_p6 }
  0x63   : > { %562 = vmatprep.subr.bf16.mxu0 %v808_v0  ;;  %p725_p0 = por %p724_p11, %p723_p12 }
  0x65   : > { %p726_p5 = pnand %p725_p0, %p719_p8 }
  0x66   : > { %564 = vmatpush3.bf16.msra.mxu0 %v563_v10 }
  0x67   : > { %565 = vmatprep.subr.bf16.mxu0 %v808_v0 }
  0x6a   : > { %567 = vmatpush3.bf16.msra.mxu0 %v566_v13 }
  0x6b   : > { %568 = vmatprep.subr.bf16.mxu0 %v808_v0 }
  0x6e   : > { %570 = vmatpush3.bf16.msra.mxu0 %v569_v16 }
  0x6f   : > { %571 = vmatprep.subr.bf16.mxu0 %v808_v0 }
  0x72   : > { %573 = vmatpush3.bf16.msra.mxu0 %v572_v19 }
  0x73   : > { %574 = vmatprep.subr.bf16.mxu0 %v808_v0 }
  0x76   : > { %576 = vmatpush3.bf16.msra.mxu0 %v575_v22 }
  0x77   : > { %577 = vmatprep.subr.bf16.mxu0 %v808_v0 }
  0x7a   : > { %579 = vmatpush3.bf16.msra.mxu0 %v578_v25 }
  0x7d   : > { %554 = vmatmul.mubr.f32.vlgmr.msra.gmra.mrb[0].mxu0 %v251_v26 }
 0x150   : > { %v334_v28 = vpop.f32.mrb[0].mxu0 }
 0x151   : > { %v361_v29 = vadd.f32 %v499_v27, %v334_v28  ;;  %v555_v30 = vpop.f32.mrb[1].mxu0 }
 0x153   : > { %362 = vst [vmem:[%s246_s9] sm:$0xff] %v361_v29 }
 0x154   : > { %729 = shalt.err (!%p726_p5)
}
 0x155   : > { %s730_s21 = scalar_lea.hbm %s1007_s29, 128  ;;  %s734_s27 = scalar_lea.hbm %s1059_s3, 256 }
 0x156   : > { %p731_p9 = scmp.ne.s32.totalorder %s1007_s29, %s730_s21  ;;  %p735_p7 = scmp.lt.u32.totalorder %s1007_s29, %s1059_s3 }
 0x157   : > { %p736_p3 = scmp.lt.u32.totalorder %s734_s27, %s730_s21  ;;  %p738_p4 = scmp.lt.u32.totalorder %s730_s21, %s1007_s29 }
 0x158   : > { %p732_p1 = pnand %p731_p9, %p928_p10 }
 0x159   : > { %p737_p13 = por %p736_p3, %p735_p7 }
 0x15a   : > { %p733_p2 = pneg %p732_p1 }
 0x15b   : > { %p739_p6 = por %p738_p4, %p737_p13 }
 0x15d   : > { %p740_p8 = pnand %p739_p6, %p733_p2 }
 0x15f   : > { %743 = shalt.err (!%p740_p8)
}
 0x160   : > { %586 = dma.vmem_to_hbm [thread:$0]  (%p928_p10), %s1009_s10, 128, %s1007_s29, %s364_s6  }
 0x161 PF: > { %s390_s22 = sand.u32 1, %s782_s12   ;;  %p1077_p12 = scmp.ne.s32.totalorder %s1067_s23, 0 }
 0x162   : > { %p1078_p11 = scmp.ge.s32.totalorder %s802_s17, 2  ;;  %s391_s24 = scalar_lea.sflag [#allocation4], %s390_s22 }
 0x164   : > { %p597_p0 = pnand %p1078_p11, %p1077_p12 }
 0x166   : > { %777 = dma.done.wait (!%p597_p0), %s391_s24, 128  }
 0x167   : > { %779 = vsyncadd (!%p597_p0), %s391_s24, 4294967168  ;;  %s20_s17 = sadd.s32 1, %s802_s17   ;;  %s1079_s12 = smov %s786_s13 }
 0x168   : > { %p17_p5 = scmp.ge.s32.totalorder %s20_s17, 4   ;;  %s1080_s13 = smov %s790_s14 }
 0x169   : > { %s1081_s14 = smov %s937_s5  ;;  %s1082_s15 = smov %s798_s16 }
 0x16a   : > { %s1083_s16 = smov %s1085_s28  ;;  %19 = sbr.rel (!%p17_p5) target bundleno = 7 (0x7), region = 97 }
 0x171   :  { %396 = vsyncpa [#allocation3], 1 }
 0x172   :  { %398 = vsyncpa [#allocation3 + $0x1], 1 }
 0x173   :  { %399 = vsyncpa [#allocation6], 1 }
 0x174   :  { %400 = vsyncpa [#allocation4], 1 }
 0x175   :  { %402 = vsyncpa [#allocation4 + $0x1], 1 }

</bundles_post_ra>
